<compile_context>
chip_gen: v6e
topology: v6e:2x2x1
jax: 0.10.0
libtpu: 0.0.40
codegen_flags: <defaults>
</compile_context>

<pallas_src>
import functools

import jax
import jax.numpy as jnp
from jax.experimental import pallas as pl
from jax.experimental.pallas import tpu as pltpu


def _lfi_kernel(x_ref, idx_ref, o_ref, *, TS, single_chunk, precision):
    # x_ref:   (1, TS, D)     source-feature chunk for this batch element
    # idx_ref: (1, TN*K, 1)   int32 neighbour indices, one per sublane
    # o_ref:   (1, TN*K, D)   gathered rows
    s = pl.program_id(2)
    x = x_ref[0]                                      # (TS, D)
    idx = idx_ref[0]                                  # (TN*K, 1)

    # One-hot row selection restricted to this source chunk. The iota is a
    # single (1, TS) row with the chunk offset folded in; the compare
    # broadcasts against the (TN*K, 1) index column.
    iota = jax.lax.broadcasted_iota(jnp.int32, (1, TS), 1) + s * TS
    onehot = (idx == iota).astype(x.dtype)            # (TN*K, TS), exact 0/1

    contrib = jnp.dot(onehot, x,
                      preferred_element_type=jnp.float32,
                      precision=precision)

    if single_chunk:
        o_ref[0] = contrib.astype(o_ref.dtype)
    else:
        @pl.when(s == 0)
        def _init():
            o_ref[...] = jnp.zeros_like(o_ref)

        # Exact even in low-precision output dtypes: each row receives exactly
        # one non-zero contribution across all source chunks.
        o_ref[0] += contrib.astype(o_ref.dtype)


def _pick_tile(total, multiple, target):
    """Largest divisor of `total` that is a multiple of `multiple` and <= target."""
    best = None
    cand = multiple
    limit = min(total, target)
    while cand <= limit:
        if total % cand == 0:
            best = cand
        cand += multiple
    return best


def _ceil_to(v, m):
    return -(-v // m) * m


def _tile_vmem_bytes(TN, TS, K, D, itemsize):
    """Rough VMEM footprint of one grid step (double-buffered blocks + temps)."""
    rows = _ceil_to(TN * K, 8)
    x_blk = 2 * _ceil_to(TS, 8) * _ceil_to(D, 128) * itemsize
    o_blk = 2 * rows * _ceil_to(D, 128) * itemsize
    i_blk = 2 * rows * 128 * 4
    onehot = rows * _ceil_to(TS, 128) * max(itemsize, 4)
    acc = rows * _ceil_to(D, 128) * 4
    return x_blk + o_blk + i_blk + onehot + acc


def _vmem_limit_bytes():
    cap = None
    try:
        cap = getattr(pltpu.get_tpu_info(), "vmem_capacity_bytes", None)
    except Exception:
        cap = None
    if not cap:
        cap = 64 * 1024 * 1024          # conservative: v7x per-TensorCore VMEM
    # Half of physical, clamped: v7x (64 MiB) -> 32 MiB, v5e/v6e (128) -> 64.
    return max(32 * 1024 * 1024, min(cap // 2, 96 * 1024 * 1024))


def _choose_tiles(N, K, D, itemsize, budget):
    # Query tile: bounded number of gathered rows per tile (multiple of 8).
    TN = _pick_tile(N, 8, max(8, 1024 // max(K, 1))) or N
    # Source chunk: prefer the whole axis resident in VMEM (single x[b] DMA,
    # no reduction axis); otherwise the largest 128-aligned (then 8-aligned)
    # divisor of N that keeps the working set under the budget.
    if _tile_vmem_bytes(TN, N, K, D, itemsize) <= budget:
        return TN, N
    for mult in (128, 8):
        ts = _pick_tile(N, mult, N)
        while ts is not None and _tile_vmem_bytes(TN, ts, K, D, itemsize) > budget:
            ts = _pick_tile(N, mult, ts - mult)
        if ts is not None and _tile_vmem_bytes(TN, ts, K, D, itemsize) <= budget:
            return TN, ts
    return TN, N     # last resort: full axis; the compiler will flag misfits


def lfi_forward(x, refer_idx, *, tile_queries=None, tile_sources=None,
                vmem_limit_bytes=None, interpret=False):
    """x: (B, N, D) float, refer_idx: (B, N, K) int -> (B, N, K*D)."""
    B, N, D = x.shape
    Bi, Ni, K = refer_idx.shape
    if (Bi, Ni) != (B, N):
        raise ValueError(f"refer_idx {refer_idx.shape} inconsistent with x {x.shape}")

    vmem_limit = vmem_limit_bytes if vmem_limit_bytes is not None else _vmem_limit_bytes()
    budget = (vmem_limit * 3) // 4
    itemsize = jnp.dtype(x.dtype).itemsize

    auto_TN, auto_TS = _choose_tiles(N, K, D, itemsize, budget)
    TN = tile_queries if tile_queries is not None else auto_TN
    TS = tile_sources if tile_sources is not None else auto_TS

    # Validate tiles up-front (no silent truncation from floor division).
    if N % TN or N % TS:
        raise ValueError(f"tile sizes must divide N={N}; got TN={TN}, TS={TS}")
    if TN != N and (TN * K) % 8:
        raise ValueError(f"TN*K must be a multiple of 8 (or TN == N); got {TN * K}")
    if TS != N and TS % 8:
        raise ValueError(f"TS must be a multiple of 8 (or TS == N); got {TS}")

    NT, ST = N // TN, N // TS
    single_chunk = ST == 1

    # Indices one-per-sublane; (B, N, K) -> (B, N*K, 1) is metadata-only.
    idx_flat = refer_idx.astype(jnp.int32).reshape(B, N * K, 1)

    # f32 needs HIGHEST so the one-hot "gather" is bit-exact on the MXU; bf16
    # is already exact (bf16 multiply, f32 accumulate).
    precision = jax.lax.Precision.HIGHEST if x.dtype == jnp.float32 else None

    x_stream_bytes = B * N * D * itemsize * (1 if single_chunk else NT)
    cost = pl.CostEstimate(
        flops=2 * B * (N * K) * N * D,                 # one-hot matmul work
        transcendentals=0,
        bytes_accessed=(x_stream_bytes                 # x: once/b, or once/tile
                        + B * N * K * 4                # indices
                        + B * N * K * D * itemsize),   # output
    )

    out = pl.pallas_call(
        functools.partial(_lfi_kernel, TS=TS, single_chunk=single_chunk,
                          precision=precision),
        out_shape=jax.ShapeDtypeStruct((B, N * K, D), x.dtype),
        grid_spec=pltpu.PrefetchScalarGridSpec(
            num_scalar_prefetch=0,
            grid=(B, NT, ST),
            in_specs=[
                pl.BlockSpec((1, TS, D), lambda b, t, s: (b, s, 0)),       # x chunk
                pl.BlockSpec((1, TN * K, 1), lambda b, t, s: (b, t, 0)),   # idx tile
            ],
            out_specs=pl.BlockSpec((1, TN * K, D), lambda b, t, s: (b, t, 0)),
        ),
        compiler_params=pltpu.CompilerParams(
            dimension_semantics=("parallel", "parallel", "arbitrary"),
            vmem_limit_bytes=vmem_limit,
        ),
        cost_estimate=cost,
        interpret=interpret,
    )(x, idx_flat)

    # (B, N*K, D) -> (B, N, K*D): identical row-major bytes (metadata-only).
    return out.reshape(B, N, K * D)


def _reference(x, refer_idx):
    B, N, D = x.shape
    K = refer_idx.shape[-1]
    flat_idx = (refer_idx + jnp.arange(B)[:, None, None] * N).reshape(-1)
    return jnp.take(x.reshape(B * N, D), flat_idx, axis=0).reshape(B, N, K * D)


if __name__ == "__main__":
    key = jax.random.PRNGKey(0)

    # Case 1: small shape; auto-tiling picks TS = N (x[b] resident, no reduction).
    k_x, k_idx, key = jax.random.split(key, 3)
    B, N, D, K = 2, 16, 8, 4
    x = jax.random.normal(k_x, (B, N, D), dtype=jnp.float32)
    refer_idx = jax.random.randint(k_idx, (B, N, K), 0, N, dtype=jnp.int32)
    out = jax.block_until_ready(lfi_forward(x, refer_idx))
    assert out.shape == (B, N, K * D)
    assert jnp.allclose(out, _reference(x, refer_idx), atol=1e-5), "case 1 mismatch"

    # Case 2: force the chunked fallback (multi query tiles + source reduction
    # accumulated directly into the output block).
    k_x, k_idx, key = jax.random.split(key, 3)
    B, N, D, K = 2, 64, 8, 4
    x = jax.random.normal(k_x, (B, N, D), dtype=jnp.float32)
    refer_idx = jax.random.randint(k_idx, (B, N, K), 0, N, dtype=jnp.int32)
    out = jax.block_until_ready(
        lfi_forward(x, refer_idx, tile_queries=16, tile_sources=32))
    assert out.shape == (B, N, K * D)
    assert jnp.allclose(out, _reference(x, refer_idx), atol=1e-5), "case 2 mismatch"

    # Case 3: bf16 features (bf16 MXU path; the gather is exact).
    k_x, k_idx, key = jax.random.split(key, 3)
    B, N, D, K = 2, 32, 16, 8
    x = jax.random.normal(k_x, (B, N, D), dtype=jnp.bfloat16)
    refer_idx = jax.random.randint(k_idx, (B, N, K), 0, N, dtype=jnp.int32)
    out = jax.block_until_ready(lfi_forward(x, refer_idx))
    assert out.shape == (B, N, K * D)
    assert jnp.array_equal(out, _reference(x, refer_idx)), "case 3 mismatch"

    print("KERNEL_OK")
</pallas_src>

<mosaic_0001>
module attributes {stable_mosaic.version = 11 : i64} {
  func.func @_lfi_kernel(%arg0: i32, %arg1: i32, %arg2: i32, %arg3: memref<1x16x8xf32, #tpu.memory_space<vmem>>, %arg4: memref<1x64x1xi32, #tpu.memory_space<vmem>>, %arg5: memref<1x64x8xf32, #tpu.memory_space<vmem>>) attributes {dimension_semantics = [#tpu.dimension_semantics<parallel>, #tpu.dimension_semantics<parallel>, #tpu.dimension_semantics<arbitrary>], iteration_bounds = array<i64: 2, 1, 1>, scalar_prefetch = 0 : i64, scratch_operands = 0 : i64, tpu.core_type = #tpu.core_type<tc>, window_params = [{transform_indices = @transform_0, window_bounds = array<i64: 1, 16, 8>}, {transform_indices = @transform_1, window_bounds = array<i64: 1, 64, 1>}, {transform_indices = @transform_2, window_bounds = array<i64: 1, 64, 8>}]} {
    %c0 = arith.constant 0 : index
    %c0_0 = arith.constant 0 : index
    %c0_1 = arith.constant 0 : index
    %0 = vector.load %arg3[%c0, %c0_0, %c0_1] : memref<1x16x8xf32, #tpu.memory_space<vmem>>, vector<1x16x8xf32>
    %1 = vector.shape_cast %0 : vector<1x16x8xf32> to vector<16x8xf32>
    %c0_2 = arith.constant 0 : index
    %c0_3 = arith.constant 0 : index
    %c0_4 = arith.constant 0 : index
    %2 = vector.load %arg4[%c0_2, %c0_3, %c0_4] : memref<1x64x1xi32, #tpu.memory_space<vmem>>, vector<1x64x1xi32>
    %3 = vector.shape_cast %2 : vector<1x64x1xi32> to vector<64x1xi32>
    %4 = tpu.iota {dimensions = array<i32: 1>} : vector<1x16xi32>
    %c16_i32 = arith.constant 16 : i32
    %5 = arith.muli %arg2, %c16_i32 : i32
    %6 = vector.broadcast %5 : i32 to vector<1x16xi32>
    %7 = arith.addi %4, %6 : vector<1x16xi32>
    %8 = vector.broadcast %3 : vector<64x1xi32> to vector<64x16xi32>
    %9 = vector.broadcast %7 : vector<1x16xi32> to vector<64x16xi32>
    %10 = arith.cmpi eq, %8, %9 : vector<64x16xi32>
    %11 = arith.extui %10 : vector<64x16xi1> to vector<64x16xi32>
    %12 = arith.sitofp %11 : vector<64x16xi32> to vector<64x16xf32>
    %cst = arith.constant dense<0.000000e+00> : vector<64x8xf32>
    %13 = tpu.matmul %12, %1, %cst {dimension_numbers = #tpu.dot_dimension_numbers<[1], [0], [0], [1], [0, 0, 1, 1], [], []>, precision = #tpu.contract_precision<fp32>} : vector<64x16xf32>, vector<16x8xf32>, vector<64x8xf32> -> vector<64x8xf32>
    %c0_5 = arith.constant 0 : index
    %c0_6 = arith.constant 0 : index
    %c0_7 = arith.constant 0 : index
    %14 = vector.load %arg5[%c0_5, %c0_6, %c0_7] : memref<1x64x8xf32, #tpu.memory_space<vmem>>, vector<1x64x8xf32>
    %15 = vector.shape_cast %14 : vector<1x64x8xf32> to vector<64x8xf32>
    %16 = vector.shape_cast %13 : vector<64x8xf32> to vector<1x64x8xf32>
    tpu.vector_store %arg5[%c0_5, %c0_6, %c0_7], %16 {strides = array<i32>} : memref<1x64x8xf32, #tpu.memory_space<vmem>>, vector<1x64x8xf32>,
    return
  }
  func.func @transform_0(%arg0: i32, %arg1: i32, %arg2: i32) -> (i32, i32, i32) {
    %c0_i32 = arith.constant 0 : i32
    %c0_i32_0 = arith.constant 0 : i32
    return %arg0, %arg2, %c0_i32 : i32, i32, i32
  }
  func.func @transform_1(%arg0: i32, %arg1: i32, %arg2: i32) -> (i32, i32, i32) {
    %c0_i32 = arith.constant 0 : i32
    %c0_i32_0 = arith.constant 0 : i32
    return %arg0, %arg1, %c0_i32 : i32, i32, i32
  }
  func.func @transform_2(%arg0: i32, %arg1: i32, %arg2: i32) -> (i32, i32, i32) {
    %c0_i32 = arith.constant 0 : i32
    %c0_i32_0 = arith.constant 0 : i32
    return %arg0, %arg1, %c0_i32 : i32, i32, i32
  }
}

</mosaic_0001>

<bundles_post_ra>
// kernel: tpu_custom_call.1
= control target key start
LH: loop header
LB: loop body
LE: loop exit
PB: predicated region body
PF: predicated region fallthrough
CT: control target
= control target key end

     0   :  { %s1464_s9 = smov 0   ;;  %s1466_s10 = smov 0   ;;  %s1683_s0 = inlined_call_operand.vmem [shape: f32[2,16,8], index: 0, kind: input, shape index: {}]   ;;  %s1684_s1 = inlined_call_operand.vmem [shape: s32[2,64,1], index: 1, kind: input, shape index: {}]   ;;  %s1685_s2 = inlined_call_operand.vmem [shape: f32[2,64,8], index: 2, kind: output, shape index: {}]  }
   0x1   :  { %s1468_s11 = smov 0  }
   0x2 LB: > { %s31_s12 = sadd.s32 1, %s1441_s10  ;;  %p1195_p0 = scmp.ge.s32.totalorder %s1445_s11, 1  ;;  %s1445_s11 = sphi %s1468_s11, %s12_s11   ;;  %s1441_s10 = sphi %s1466_s10, %s1687_s10   ;;  %s1437_s9 = sphi %s1464_s9, %s1686_s9  }
   0x3   : > { %p33_p1 = scmp.ge.s32.totalorder %s31_s12, 2  ;;  %p157_p2 = scmp.lt.s32.totalorder %s1445_s11, 3 }
   0x5   : > { %s1689_s12 = smov (%p33_p1, %s31_s12), 0  ;;  %p158_p3 = pnand %p1195_p0, %p157_p2 }
   0x6   : > { %p197_p4 = scmp.lt.s32.totalorder (!%p158_p3), %s1437_s9, 1 }
   0x7   : > { %161 = sbr.rel (%p158_p3) target bundleno = 399 (0x18f), region = 28 }
   0xc   : > { %v1447_v0 = vmov 0   ;;  %s1691_s9 = smov (!%p197_p4, %s1437_s9), 1  ;;  %v236_v21 = vlaneseq  ;;  %vm289_vm0 = vcmask 130048   ;;  %v1448_v25 = vmov 0.0  }
   0xd   : > { %1422 = vset.pattern.permute.xlu1 %v1447_v0  ;;  %1421 = vset.pattern.permute.xlu0 %v1447_v0  ;;  %s1237_s13 = sshll.u32 %s1691_s9, 6  ;;  %s1236_s14 = sshll.u32 %s1691_s9, 4  ;;  %vm1074_vm9 = vcmask 64512  }
   0xe   : > { %s214_s17 = scalar_lea.vmem %s1684_s1, %s1237_s13  ;;  %s204_s20 = scalar_lea.vmem %s1683_s0, %s1236_s14  ;;  %v237_v22 = vand.u32 127, %v236_v21 }
   0xf   : > { %v230_v1 = vld [vmem:[%s214_s17 + $0x10] sm:$0xff]  ;;  %v228_v2 = vld [vmem:[%s214_s17] sm:$0xff]  ;;  %v231_v3 = vld [vmem:[%s214_s17 + $0x18] sm:$0xff]  ;;  %s1655_s23 = scalar_lea.vmem %s1685_s2, %s1237_s13 }
  0x10   : > { %248 = vperm.xlu1 %1422, %v230_v1   ;;  %242 = vperm.xlu0 %1421, %v228_v2   ;;  %v229_v4 = vld [vmem:[%s214_s17 + $0x8] sm:$0xff]  ;;  %v226_v5 = vld [vmem:[%s204_s20] sm:$0xff]  ;;  %v235_v16 = vld [vmem:[%s214_s17 + $0x38] sm:$0xff] }
  0x11   : > { %v227_v6 = vld [vmem:[%s204_s20 + $0x8] sm:$0xff]  ;;  %v1494_v7 = vand.u32 4294901760, %v226_v5  ;;  %v232_v11 = vld [vmem:[%s214_s17 + $0x20] sm:$0xff]  ;;  %v234_v17 = vld [vmem:[%s214_s17 + $0x30] sm:$0xff] }
  0x12   : > { %v1496_v8 = vand.u32 4294901760, %v227_v6  ;;  %v233_v10 = vld [vmem:[%s214_s17 + $0x28] sm:$0xff] }
  0x13   : > { %v1499_v9 = vsub.f32 %v226_v5, %v1494_v7 }
  0x14   : > { %251 = vperm.xlu1 %1422, %v231_v3   ;;  %245 = vperm.xlu0 %1421, %v229_v4   ;;  %v1502_v12 = vsub.f32 %v227_v6, %v1496_v8 }
  0x15   : > { %1299 = vmatprep.subr.mxu0 %v1496_v8  ;;  %v1506_v13 = vand.u32 4294901760, %v1499_v9 }
  0x16   : > { %1300 = vmatpush3.msra.mxu0 %v1496_v8  ;;  %v1510_v14 = vand.u32 4294901760, %v1502_v12 }
  0x17   : > { %1301 = vmatprep.subr.mxu0 %v1494_v7  ;;  %v500_v15 = vsub.f32 %v1499_v9, %v1506_v13 }
  0x18   : > { %257 = vperm.xlu1 %1422, %v233_v10   ;;  %254 = vperm.xlu0 %1421, %v232_v11   ;;  %v493_v18 = vsub.f32 %v1502_v12, %v1510_v14 }
  0x19   : > { %1302 = vmatpush3.msra.mxu0 %v1494_v7  ;;  %v501_v20 = vand.u32 4294901760, %v500_v15 }
  0x1a   : > { %1331 = vmatprep.subr.mxu0 %v1502_v12  ;;  %v494_v19 = vand.u32 4294901760, %v493_v18 }
  0x1c   : > { %263 = vperm.xlu1 %1422, %v235_v16   ;;  %260 = vperm.xlu0 %1421, %v234_v17  }
  0x1d   : > { %1315 = vmatprep.subr.mxu1 %v494_v19 }
  0x1e   : > { %1316 = vmatpush3.msra.mxu1 %v494_v19 }
  0x1f   : > { %1317 = vmatprep.subr.mxu1 %v501_v20 }
  0x20   : > { %1318 = vmatpush3.msra.mxu1 %v501_v20 }
  0x21   : > { %1347 = vmatprep.subr.mxu1 %v1496_v8 }
  0x8b   : > { %v249_v23 = vpop.permute.xlu1 %248  ;;  %v243_v24 = vpop.permute.xlu0 %242 }
  0x8c   : > { %vm267_vm1 = vcmp.eq.s32.totalorder %v249_v23, %v237_v22  ;;  %vm265_vm2 = vcmp.eq.s32.totalorder %v243_v24, %v237_v22 }
  0x8d   : > { %v1520_v26 = vsel %vm267_vm1, 1.0, %v1448_v25  ;;  %v1522_v27 = vsel %vm265_vm2, 1.0, %v1448_v25 }
  0x8e   : > { %v297_v28 = vsel %vm289_vm0, %v1520_v26, 0  ;;  %1319 = vmatprep.mubr.msk.f32.mxu1 %vm289_vm0, %v1522_v27  ;;  %v291_v29 = vsel %vm289_vm0, %v1522_v27, 0 }
  0x8f   : > { %v1530_v30 = vsub.f32 %v297_v28, %v297_v28  ;;  %v252_v31 = vpop.permute.xlu1 %251  ;;  %v246_v32 = vpop.permute.xlu0 %245  ;;  %v1532_v33 = vsub.f32 %v291_v29, %v291_v29 }
  0x90   : > { %vm268_vm3 = vcmp.eq.s32.totalorder %v252_v31, %v237_v22  ;;  %vm266_vm4 = vcmp.eq.s32.totalorder %v246_v32, %v237_v22 }
  0x91   : > { %v1534_v34 = vsel %vm268_vm3, 1.0, %v1448_v25  ;;  %v1536_v35 = vsel %vm266_vm4, 1.0, %v1448_v25  ;;  %v383_v36 = vand.u32 4294901760, %v1532_v33  ;;  %v403_v39 = vand.u32 4294901760, %v1530_v30 }
  0x92   : > { %v300_v37 = vsel %vm289_vm0, %v1534_v34, 0  ;;  %v294_v38 = vsel %vm289_vm0, %v1536_v35, 0  ;;  %1320 = vmatmul.mubr.msk.f32.vlgmr.msra.gmra.mxu1 %vm289_vm0, %v1536_v35 }
  0x93   : > { %v1546_v40 = vsub.f32 %v300_v37, %v300_v37  ;;  %v1548_v41 = vsub.f32 %v294_v38, %v294_v38  ;;  %v258_v42 = vpop.permute.xlu1 %257  ;;  %v255_v43 = vpop.permute.xlu0 %254  ;;  %1322 = vmatprep.mubr.msk.f32.mxu1 %vm289_vm0, %v1520_v26  ;;  %v384_v44 = vsub.f32 %v1532_v33, %v383_v36  ;;  %1348 = vmatpush3.msra.mxu1 %v1496_v8 }
  0x94   : > { %vm270_vm5 = vcmp.eq.s32.totalorder %v258_v42, %v237_v22  ;;  %vm269_vm6 = vcmp.eq.s32.totalorder %v255_v43, %v237_v22  ;;  %1349 = vmatprep.subr.mxu1 %v1494_v7  ;;  %v404_v51 = vsub.f32 %v1530_v30, %v403_v39 }
  0x95   : > { %v1554_v45 = vsel %vm270_vm5, 1.0, %v1448_v25  ;;  %v1556_v46 = vsel %vm269_vm6, 1.0, %v1448_v25  ;;  %v385_v47 = vand.u32 4294901760, %v384_v44  ;;  %v393_v48 = vand.u32 4294901760, %v1548_v41  ;;  %1350 = vmatpush3.msra.mxu1 %v1494_v7 }
  0x96   : > { %v306_v49 = vsel %vm289_vm0, %v1554_v45, 0  ;;  %v303_v50 = vsel %vm289_vm0, %v1556_v46, 0  ;;  %1323 = vmatmul.mubr.msk.f32.gmra.mxu1 %vm289_vm0, %v1534_v34  ;;  %v413_v52 = vand.u32 4294901760, %v1546_v40  ;;  %1379 = vmatprep.subr.mxu1 %v1496_v8  ;;  %v405_v1 = vand.u32 4294901760, %v404_v51 }
  0x97   : > { %v1570_v53 = vsub.f32 %v306_v49, %v306_v49  ;;  %v1572_v54 = vsub.f32 %v303_v50, %v303_v50  ;;  %v264_v55 = vpop.permute.xlu1 %263  ;;  %1303 = vmatprep.mubr.f32.mxu0 %v385_v47  ;;  %v261_v56 = vpop.permute.xlu0 %260  ;;  %1325 = vmatprep.mubr.msk.f32.mxu1 %vm289_vm0, %v1556_v46  ;;  %v394_v57 = vsub.f32 %v1548_v41, %v393_v48 }
  0x98   : > { %vm272_vm7 = vcmp.eq.s32.totalorder %v264_v55, %v237_v22  ;;  %vm271_vm8 = vcmp.eq.s32.totalorder %v261_v56, %v237_v22  ;;  %v414_v58 = vsub.f32 %v1546_v40, %v413_v52 }
  0x99   : > { %v1579_v59 = vsel %vm272_vm7, 1.0, %v1448_v25  ;;  %v1581_v60 = vsel %vm271_vm8, 1.0, %v1448_v25  ;;  %v395_v61 = vand.u32 4294901760, %v394_v57  ;;  %v423_v62 = vand.u32 4294901760, %v1572_v54 }
  0x9a   : > { %v312_v63 = vsel %vm289_vm0, %v1579_v59, 0  ;;  %v309_v0 = vsel %vm289_vm0, %v1581_v60, 0  ;;  %1326 = vmatmul.mubr.msk.f32.gmra.mxu1 %vm289_vm0, %v1554_v45  ;;  %v433_v2 = vand.u32 4294901760, %v1570_v53  ;;  %v415_v6 = vand.u32 4294901760, %v414_v58 }
  0x9b   : > { %v452_v3 = vsub.f32 %v312_v63, %v312_v63  ;;  %v442_v4 = vsub.f32 %v309_v0, %v309_v0  ;;  %1304 = vmatmul.mubr.f32.vlgmr.msra.gmra.mxu0 %v395_v61  ;;  %1328 = vmatprep.mubr.msk.f32.mxu1 %vm289_vm0, %v1581_v60  ;;  %v424_v5 = vsub.f32 %v1572_v54, %v423_v62 }
  0x9c   : > { %1332 = vmatpush3.msra.mxu0 %v1502_v12  ;;  %1306 = vmatprep.mubr.f32.mxu0 %v405_v1  ;;  %v434_v11 = vsub.f32 %v1570_v53, %v433_v2 }
  0x9d   : > { %v425_v10 = vand.u32 4294901760, %v424_v5  ;;  %1333 = vmatprep.subr.mxu0 %v1499_v9  ;;  %v443_v15 = vand.u32 4294901760, %v442_v4  ;;  %v453_v16 = vand.u32 4294901760, %v452_v3 }
  0x9e   : > { %1329 = vmatmul.mubr.msk.f32.gmra.mxu1 %vm289_vm0, %v1579_v59  ;;  %1334 = vmatpush3.msra.mxu0 %v1499_v9  ;;  %v435_v12 = vand.u32 4294901760, %v434_v11 }
  0x9f   : > { %1307 = vmatmul.mubr.f32.gmra.mxu0 %v415_v6  ;;  %1351 = vmatprep.mubr.f32.mxu1 %v383_v36  ;;  %v444_v17 = vsub.f32 %v442_v4, %v443_v15  ;;  %v454_v19 = vsub.f32 %v452_v3, %v453_v16 }
  0xa0   : > { %1309 = vmatprep.mubr.f32.mxu0 %v425_v10  ;;  %1363 = vmatprep.subr.mxu0 %v1510_v14 }
  0xa1   : > { %v445_v18 = vand.u32 4294901760, %v444_v17  ;;  %v455_v20 = vand.u32 4294901760, %v454_v19 }
  0xa2   : > { %1352 = vmatmul.mubr.f32.vlgmr.msra.gmra.mxu1 %v393_v48 }
  0xa3   : > { %1310 = vmatmul.mubr.f32.gmra.mxu0 %v435_v12  ;;  %1354 = vmatprep.mubr.f32.mxu1 %v403_v39 }
  0xa4   : > { %1312 = vmatprep.mubr.f32.mxu0 %v445_v18  ;;  %1380 = vmatpush3.msra.mxu1 %v1496_v8 }
  0xa5   : > { %1381 = vmatprep.subr.mxu1 %v1494_v7 }
  0xa6   : > { %1355 = vmatmul.mubr.f32.gmra.mxu1 %v413_v52 }
  0xa7   : > { %1313 = vmatmul.mubr.f32.gmra.mxu0 %v455_v20  ;;  %1357 = vmatprep.mubr.f32.mxu1 %v423_v62 }
  0xa8   : > { %1335 = vmatprep.mubr.f32.mxu0 %v1532_v33  ;;  %1382 = vmatpush3.msra.mxu1 %v1494_v7 }
  0xaa   : > { %1358 = vmatmul.mubr.f32.gmra.mxu1 %v433_v2 }
  0xab   : > { %1336 = vmatmul.mubr.f32.vlgmr.msra.gmra.mxu0 %v1548_v41  ;;  %1360 = vmatprep.mubr.f32.mxu1 %v443_v15 }
  0xac   : > { %1364 = vmatpush3.msra.mxu0 %v1510_v14  ;;  %1338 = vmatprep.mubr.f32.mxu0 %v1530_v30 }
  0xad   : > { %1365 = vmatprep.subr.mxu0 %v1506_v13 }
  0xae   : > { %1361 = vmatmul.mubr.f32.gmra.mxu1 %v453_v16  ;;  %1366 = vmatpush3.msra.mxu0 %v1506_v13 }
  0xaf   : > { %1339 = vmatmul.mubr.f32.gmra.mxu0 %v1546_v40  ;;  %1383 = vmatprep.mubr.msk.f32.mxu1 %vm289_vm0, %v1522_v27 }
  0xb0   : > { %1341 = vmatprep.mubr.f32.mxu0 %v1572_v54 }
  0xb2   : > { %1384 = vmatmul.mubr.msk.f32.vlgmr.msra.gmra.mxu1 %vm289_vm0, %v1536_v35 }
  0xb3   : > { %1342 = vmatmul.mubr.f32.gmra.mxu0 %v1570_v53  ;;  %1386 = vmatprep.mubr.msk.f32.mxu1 %vm289_vm0, %v1520_v26 }
  0xb4   : > { %1344 = vmatprep.mubr.f32.mxu0 %v442_v4 }
  0xb6   : > { %1387 = vmatmul.mubr.msk.f32.gmra.mxu1 %vm289_vm0, %v1534_v34 }
  0xb7   : > { %1345 = vmatmul.mubr.f32.gmra.mxu0 %v452_v3  ;;  %1389 = vmatprep.mubr.msk.f32.mxu1 %vm289_vm0, %v1556_v46 }
  0xb8   : > { %1367 = vmatprep.mubr.msk.f32.mxu0 %vm289_vm0, %v1522_v27 }
  0xba   : > { %1390 = vmatmul.mubr.msk.f32.gmra.mxu1 %vm289_vm0, %v1554_v45 }
  0xbb   : > { %1368 = vmatmul.mubr.msk.f32.vlgmr.msra.gmra.mxu0 %vm289_vm0, %v1536_v35  ;;  %1392 = vmatprep.mubr.msk.f32.mxu1 %vm289_vm0, %v1581_v60 }
  0xbc   : > { %1370 = vmatprep.mubr.msk.f32.mxu0 %vm289_vm0, %v1520_v26 }
  0xbe   : > { %1393 = vmatmul.mubr.msk.f32.gmra.mxu1 %vm289_vm0, %v1579_v59 }
  0xbf   : > { %1371 = vmatmul.mubr.msk.f32.gmra.mxu0 %vm289_vm0, %v1534_v34 }
  0xc0   : > { %1373 = vmatprep.mubr.msk.f32.mxu0 %vm289_vm0, %v1556_v46 }
  0xc3   : > { %1374 = vmatmul.mubr.msk.f32.gmra.mxu0 %vm289_vm0, %v1554_v45 }
  0xc4   : > { %1376 = vmatprep.mubr.msk.f32.mxu0 %vm289_vm0, %v1581_v60 }
  0xc7   : > { %1377 = vmatmul.mubr.msk.f32.gmra.mxu0 %vm289_vm0, %v1579_v59 }
 0x152   : > { %v1321_v7 = vpop.f32.mrf.mxu1 }
 0x154   : > { %v538_v8 = vpop.f32.mrf.mxu1 }
 0x156   : > { %v1324_v9 = vpop.f32.mrf.mxu1 }
 0x158   : > { %v550_v13 = vpop.f32.mrf.mxu1 }
 0x15a   : > { %v1327_v14 = vpop.f32.mrf.mxu1 }
 0x15b   : > { %v1305_v21 = vpop.f32.mrf.mxu0 }
 0x15c   : > { %v562_v22 = vpop.f32.mrf.mxu1  ;;  %v545_v46 = vadd.f32 %v1321_v7, %v1305_v21 }
 0x15d   : > { %v387_v23 = vpop.f32.mrf.mxu0 }
 0x15e   : > { %v1330_v24 = vpop.f32.mrf.mxu1  ;;  %v539_v49 = vadd.f32 %v538_v8, %v387_v23 }
 0x15f   : > { %v1308_v25 = vpop.f32.mrf.mxu0 }
 0x160   : > { %v574_v26 = vpop.f32.mrf.mxu1  ;;  %v557_v53 = vadd.f32 %v1324_v9, %v1308_v25 }
 0x161   : > { %v407_v27 = vpop.f32.mrf.mxu0 }
 0x162   : > { %v1353_v28 = vpop.f32.mrf.mxu1  ;;  %v551_v56 = vadd.f32 %v550_v13, %v407_v27 }
 0x163   : > { %v1311_v29 = vpop.f32.mrf.mxu0 }
 0x164   : > { %v780_v30 = vpop.f32.mrf.mxu1  ;;  %v569_v61 = vadd.f32 %v1327_v14, %v1311_v29 }
 0x165   : > { %v427_v31 = vpop.f32.mrf.mxu0 }
 0x166   : > { %v1356_v32 = vpop.f32.mrf.mxu1  ;;  %v563_v1 = vadd.f32 %v562_v22, %v427_v31 }
 0x167   : > { %v1314_v33 = vpop.f32.mrf.mxu0 }
 0x168   : > { %v796_v34 = vpop.f32.mrf.mxu1  ;;  %v581_v10 = vadd.f32 %v1330_v24, %v1314_v33 }
 0x169   : > { %v447_v35 = vpop.f32.mrf.mxu0 }
 0x16a   : > { %v1359_v36 = vpop.f32.mrf.mxu1  ;;  %v575_v19 = vadd.f32 %v574_v26, %v447_v35 }
 0x16b   : > { %v1337_v37 = vpop.f32.mrf.mxu0 }
 0x16c   : > { %v812_v38 = vpop.f32.mrf.mxu1  ;;  %v664_v50 = vadd.f32 %v1337_v37, %v545_v46 }
 0x16d   : > { %v656_v39 = vpop.f32.mrf.mxu0 }
 0x16e   : > { %v1362_v40 = vpop.f32.mrf.mxu1  ;;  %v657_v54 = vadd.f32 %v656_v39, %v539_v49  ;;  %v789_v58 = vadd.f32 %v1353_v28, %v664_v50 }
 0x16f   : > { %v1340_v41 = vpop.f32.mrf.mxu0 }
 0x170   : > { %v1648_v42 = vpop.f32.mrf.mxu1  ;;  %v678_v57 = vadd.f32 %v1340_v41, %v557_v53  ;;  %v781_v0 = vadd.f32 %v780_v30, %v657_v54 }
 0x171   : > { %v670_v43 = vpop.f32.mrf.mxu0 }
 0x172   : > { %v1385_v44 = vpop.f32.mrf.mxu1  ;;  %v671_v62 = vadd.f32 %v670_v43, %v551_v56  ;;  %v805_v6 = vadd.f32 %v1356_v32, %v678_v57 }
 0x173   : > { %v1343_v45 = vpop.f32.mrf.mxu0 }
 0x174   : > { %v1028_v47 = vpop.f32.mrf.mxu1  ;;  %v692_v3 = vadd.f32 %v1343_v45, %v569_v61  ;;  %v797_v18 = vadd.f32 %v796_v34, %v671_v62 }
 0x175   : > { %v684_v48 = vpop.f32.mrf.mxu0 }
 0x176   : > { %v1388_v51 = vpop.f32.mrf.mxu1  ;;  %v685_v16 = vadd.f32 %v684_v48, %v563_v1  ;;  %v821_v13 = vadd.f32 %v1359_v36, %v692_v3 }
 0x177   : > { %v1346_v52 = vpop.f32.mrf.mxu0 }
 0x178   : > { %v1040_v59 = vpop.f32.mrf.mxu1  ;;  %v706_v7 = vadd.f32 %v1346_v52, %v581_v10  ;;  %v813_v25 = vadd.f32 %v812_v38, %v685_v16 }
 0x179   : > { %v698_v55 = vpop.f32.mrf.mxu0 }
 0x17a   : > { %v1391_v11 = vpop.f32.mrf.mxu1  ;;  %v699_v22 = vadd.f32 %v698_v55, %v575_v19  ;;  %v837_v29 = vadd.f32 %v1362_v40, %v706_v7 }
 0x17b   : > { %v1369_v60 = vpop.f32.mrf.mxu0 }
 0x17c   : > { %v920_v63 = vadd.f32 %v1369_v60, %v789_v58  ;;  %v1052_v14 = vpop.f32.mrf.mxu1  ;;  %v829_v34 = vadd.f32 %v1648_v42, %v699_v22 }
 0x17d   : > { %v913_v2 = vpop.f32.mrf.mxu0 }
 0x17e   : > { %v1035_v4 = vadd.f32 %v1385_v44, %v920_v63  ;;  %v914_v5 = vadd.f32 %v913_v2, %v781_v0  ;;  %v1394_v30 = vpop.f32.mrf.mxu1 }
 0x17f   : > { %v1372_v15 = vpop.f32.mrf.mxu0 }
 0x180   : > { %1076 = vst.msk [vmem:[%s1655_s23 + $0x8] sm:$0xff] %vm1074_vm9, %v1035_v4  ;;  %v1029_v17 = vadd.f32 %v1028_v47, %v914_v5  ;;  %v932_v12 = vadd.f32 %v1372_v15, %v805_v6  ;;  %v1064_v38 = vpop.f32.mrf.mxu1 }
 0x181   : > { %v925_v20 = vpop.f32.mrf.mxu0 }
 0x182   : > { %1075 = vst.msk [vmem:[%s1655_s23] sm:$0xff] %vm1074_vm9, %v1029_v17  ;;  %v1047_v8 = vadd.f32 %v1388_v51, %v932_v12  ;;  %v926_v9 = vadd.f32 %v925_v20, %v797_v18 }
 0x183   : > { %v1375_v21 = vpop.f32.mrf.mxu0 }
 0x184   : > { %1078 = vst.msk [vmem:[%s1655_s23 + $0x18] sm:$0xff] %vm1074_vm9, %v1047_v8  ;;  %v1041_v23 = vadd.f32 %v1040_v59, %v926_v9  ;;  %v944_v24 = vadd.f32 %v1375_v21, %v821_v13 }
 0x185   : > { %v937_v27 = vpop.f32.mrf.mxu0 }
 0x186   : > { %1077 = vst.msk [vmem:[%s1655_s23 + $0x10] sm:$0xff] %vm1074_vm9, %v1041_v23  ;;  %v1059_v26 = vadd.f32 %v1391_v11, %v944_v24  ;;  %v938_v28 = vadd.f32 %v937_v27, %v813_v25 }
 0x187   : > { %v1378_v31 = vpop.f32.mrf.mxu0 }
 0x188   : > { %1080 = vst.msk [vmem:[%s1655_s23 + $0x28] sm:$0xff] %vm1074_vm9, %v1059_v26  ;;  %v1053_v32 = vadd.f32 %v1052_v14, %v938_v28  ;;  %v956_v33 = vadd.f32 %v1378_v31, %v837_v29 }
 0x189   : > { %v949_v35 = vpop.f32.mrf.mxu0 }
 0x18a   : > { %1079 = vst.msk [vmem:[%s1655_s23 + $0x20] sm:$0xff] %vm1074_vm9, %v1053_v32  ;;  %v1071_v36 = vadd.f32 %v1394_v30, %v956_v33  ;;  %v950_v37 = vadd.f32 %v949_v35, %v829_v34 }
 0x18c   : > { %1082 = vst.msk [vmem:[%s1655_s23 + $0x38] sm:$0xff] %vm1074_vm9, %v1071_v36  ;;  %v1065_v39 = vadd.f32 %v1064_v38, %v950_v37 }
 0x18e   : > { %1081 = vst.msk [vmem:[%s1655_s23 + $0x30] sm:$0xff] %vm1074_vm9, %v1065_v39 }
 0x18f PF: > { %s12_s11 = sadd.s32 1, %s1445_s11   ;;  %s1686_s9 = smov %s1441_s10 }
 0x190   : > { %p9_p5 = scmp.ge.s32.totalorder %s12_s11, 4   ;;  %s1687_s10 = smov %s1689_s12 }
 0x192   :  { %11 = sbr.rel (!%p9_p5) target bundleno = 2 (0x2), region = 61 }

</bundles_post_ra>
